<compile_context>
chip_gen: v5e
topology: v5e:2x2
jax: 0.10.0
libtpu: 0.0.40
codegen_flags: <defaults>
</compile_context>

<pallas_src>
import functools

import jax
import jax.numpy as jnp
from jax.experimental import pallas as pl
from jax.experimental.pallas import tpu as pltpu


def _flash_attention_kernel(q_ref, k_ref, v_ref, o_ref,
                            m_scr, l_scr, acc_scr, *, scale):
    """One (batch, q-tile, kv-tile) grid step of flash attention.

    Block shapes: q_ref (1, tq, D), k_ref/v_ref (1, tk, D), o_ref (1, tq, D).
    Scratch persists across the kv axis: m (tq,1), l (tq,1), acc (tq,D), all f32.
    """
    kv = pl.program_id(2)

    @pl.when(kv == 0)
    def _init():
        m_scr[...] = jnp.full_like(m_scr, -jnp.inf)
        l_scr[...] = jnp.zeros_like(l_scr)
        acc_scr[...] = jnp.zeros_like(acc_scr)

    q = q_ref[0]  # (tq, D)
    k = k_ref[0]  # (tk, D)
    v = v_ref[0]  # (tk, D)

    # Fold the 1/sqrt(D) scale into q (tq*D multiplies, not tq*tk on the scores).
    qs = q * jnp.asarray(scale, dtype=q.dtype)

    # s[i, j] = sum_d qs[i, d] * k[j, d] — contract dim 1 against dim 1 directly,
    # no explicit k.T (avoids an XLU transpose before the MXU push). f32 accumulate.
    s = jax.lax.dot_general(
        qs, k,
        dimension_numbers=(((1,), (1,)), ((), ())),
        preferred_element_type=jnp.float32,
    )  # (tq, tk) float32

    # Online (streaming) softmax update — all softmax math in f32.
    m_prev = m_scr[...]
    m_new = jnp.maximum(m_prev, jnp.max(s, axis=-1, keepdims=True))
    alpha = jnp.exp(m_prev - m_new)        # rescale factor for previous kv tiles
    p = jnp.exp(s - m_new)                 # unnormalized probabilities (tq, tk)

    l_scr[...] = alpha * l_scr[...] + jnp.sum(p, axis=-1, keepdims=True)
    # PV matmul in the value dtype (bf16 inputs => bf16 MXU), f32 accumulation.
    acc_scr[...] = alpha * acc_scr[...] + jnp.dot(
        p.astype(v.dtype), v, preferred_element_type=jnp.float32)
    m_scr[...] = m_new

    @pl.when(kv == pl.num_programs(2) - 1)
    def _finalize():
        # Normalize the (tq, D) output once (not the (tq, tk) score matrix);
        # approx reciprocal runs on the EUP slot (effectively free).
        inv_l = pl.reciprocal(l_scr[...], approx=True)
        o_ref[0] = (acc_scr[...] * inv_l).astype(o_ref.dtype)


def _pick_tile(n: int, target: int) -> int:
    """Largest divisor of n that is <= target and a multiple of 8, else n."""
    if n <= target:
        return n
    for t in range(target, 7, -8):
        if n % t == 0:
            return t
    return n


def attention(q, k, v, *, tq_target: int = 256, tk_target: int = 256):
    """Pallas TPU implementation of the PyTorch Attention.forward (eval mode).

    Tile targets of 256 fit comfortably in v7x's 64 MiB VMEM (and v5e/v6e's
    128 MiB); on v5e, 128 for tq_target is also a reasonable choice.
    """
    B, N, D = q.shape
    assert k.shape == (B, N, D) and v.shape == (B, N, D)
    scale = float(D) ** (-0.5)

    tq = _pick_tile(N, tq_target)
    tk = _pick_tile(N, tk_target)

    kernel = functools.partial(_flash_attention_kernel, scale=scale)

    q_spec = pl.BlockSpec((1, tq, D), lambda b, qi, ki: (b, qi, 0))
    kv_spec = pl.BlockSpec((1, tk, D), lambda b, qi, ki: (b, ki, 0))
    # Output block index is constant across the kv axis -> accumulator-resident
    # in VMEM, written to HBM only once per (b, qi).
    o_spec = pl.BlockSpec((1, tq, D), lambda b, qi, ki: (b, qi, 0))

    return pl.pallas_call(
        kernel,
        out_shape=jax.ShapeDtypeStruct((B, N, D), q.dtype),
        grid_spec=pltpu.PrefetchScalarGridSpec(
            num_scalar_prefetch=0,
            grid=(B, N // tq, N // tk),
            in_specs=[q_spec, kv_spec, kv_spec],
            out_specs=o_spec,
            scratch_shapes=[
                pltpu.VMEM((tq, 1), jnp.float32),   # running max m
                pltpu.VMEM((tq, 1), jnp.float32),   # running sum l
                pltpu.VMEM((tq, D), jnp.float32),   # f32 output accumulator
            ],
        ),
        compiler_params=pltpu.CompilerParams(
            dimension_semantics=("parallel", "parallel", "arbitrary"),
            # Explicit scoped-VMEM budget with headroom on all chips
            # (v7x physical VMEM is 64 MiB, v5e/v6e 128 MiB).
            vmem_limit_bytes=32 * 1024 * 1024,
        ),
    )(q, k, v)


def attention_ref(q, k, v):
    """Pure-JAX reference mirroring the PyTorch module (eval mode)."""
    D = q.shape[-1]
    dots = jnp.einsum("bid,bjd->bij", q, k) * (float(D) ** (-0.5))
    attn = jax.nn.softmax(dots, axis=-1)
    return jnp.einsum("bij,bjd->bid", attn, v)


if __name__ == "__main__":
    # Small shapes consistent with the module: batch=2, seq=8, dim=32.
    B, N, D = 2, 8, 32
    key = jax.random.PRNGKey(0)
    kq, kk, kv = jax.random.split(key, 3)
    q = jax.random.normal(kq, (B, N, D), dtype=jnp.float32)
    k = jax.random.normal(kk, (B, N, D), dtype=jnp.float32)
    v = jax.random.normal(kv, (B, N, D), dtype=jnp.float32)

    out = attention(q, k, v)
    out = jax.block_until_ready(out)

    ref = attention_ref(q, k, v)
    assert out.shape == (B, N, D)
    # Slightly relaxed tolerance: the final 1/l scaling uses the EUP approximate
    # reciprocal (pl.reciprocal(approx=True)).
    assert jnp.allclose(out, ref, atol=5e-3, rtol=5e-3), "mismatch vs reference"

    print("KERNEL_OK")
</pallas_src>

<mosaic_0001>
module attributes {stable_mosaic.version = 11 : i64} {
  func.func @_flash_attention_kernel(%arg0: i32, %arg1: i32, %arg2: i32, %arg3: memref<1x8x32xf32, #tpu.memory_space<vmem>>, %arg4: memref<1x8x32xf32, #tpu.memory_space<vmem>>, %arg5: memref<1x8x32xf32, #tpu.memory_space<vmem>>, %arg6: memref<1x8x32xf32, #tpu.memory_space<vmem>>, %arg7: memref<8x1xf32, #tpu.memory_space<vmem>>, %arg8: memref<8x1xf32, #tpu.memory_space<vmem>>, %arg9: memref<8x32xf32, #tpu.memory_space<vmem>>) attributes {dimension_semantics = [#tpu.dimension_semantics<parallel>, #tpu.dimension_semantics<parallel>, #tpu.dimension_semantics<arbitrary>], iteration_bounds = array<i64: 2, 1, 1>, scalar_prefetch = 0 : i64, scratch_operands = 3 : i64, tpu.core_type = #tpu.core_type<tc>, window_params = [{transform_indices = @transform_0, window_bounds = array<i64: 1, 8, 32>}, {transform_indices = @transform_1, window_bounds = array<i64: 1, 8, 32>}, {transform_indices = @transform_2, window_bounds = array<i64: 1, 8, 32>}, {transform_indices = @transform_3, window_bounds = array<i64: 1, 8, 32>}]} {
    %c0_i32 = arith.constant 0 : i32
    %0 = arith.cmpi eq, %arg2, %c0_i32 : i32
    %1 = arith.extui %0 : i1 to i32
    %c0_i32_0 = arith.constant 0 : i32
    %2 = arith.cmpi ne, %1, %c0_i32_0 : i32
    scf.if %2 {
      %cst_27 = arith.constant 0xFF800000 : f32
      %37 = vector.broadcast %cst_27 : f32 to vector<8x1xf32>
      %c0_28 = arith.constant 0 : index
      %c0_29 = arith.constant 0 : index
      %38 = vector.load %arg7[%c0_28, %c0_29] : memref<8x1xf32, #tpu.memory_space<vmem>>, vector<8x1xf32>
      tpu.vector_store %arg7[%c0_28, %c0_29], %37 {strides = array<i32>} : memref<8x1xf32, #tpu.memory_space<vmem>>, vector<8x1xf32>,
      %cst_30 = arith.constant 0.000000e+00 : f32
      %39 = vector.broadcast %cst_30 : f32 to vector<8x1xf32>
      %c0_31 = arith.constant 0 : index
      %c0_32 = arith.constant 0 : index
      %40 = vector.load %arg8[%c0_31, %c0_32] : memref<8x1xf32, #tpu.memory_space<vmem>>, vector<8x1xf32>
      tpu.vector_store %arg8[%c0_31, %c0_32], %39 {strides = array<i32>} : memref<8x1xf32, #tpu.memory_space<vmem>>, vector<8x1xf32>,
      %cst_33 = arith.constant 0.000000e+00 : f32
      %41 = vector.broadcast %cst_33 : f32 to vector<8x32xf32>
      %c0_34 = arith.constant 0 : index
      %c0_35 = arith.constant 0 : index
      %42 = vector.load %arg9[%c0_34, %c0_35] : memref<8x32xf32, #tpu.memory_space<vmem>>, vector<8x32xf32>
      tpu.vector_store %arg9[%c0_34, %c0_35], %41 {strides = array<i32>} : memref<8x32xf32, #tpu.memory_space<vmem>>, vector<8x32xf32>,
    } else {
    }
    %c0 = arith.constant 0 : index
    %c0_1 = arith.constant 0 : index
    %c0_2 = arith.constant 0 : index
    %3 = vector.load %arg3[%c0, %c0_1, %c0_2] : memref<1x8x32xf32, #tpu.memory_space<vmem>>, vector<1x8x32xf32>
    %4 = vector.shape_cast %3 : vector<1x8x32xf32> to vector<8x32xf32>
    %c0_3 = arith.constant 0 : index
    %c0_4 = arith.constant 0 : index
    %c0_5 = arith.constant 0 : index
    %5 = vector.load %arg4[%c0_3, %c0_4, %c0_5] : memref<1x8x32xf32, #tpu.memory_space<vmem>>, vector<1x8x32xf32>
    %6 = vector.shape_cast %5 : vector<1x8x32xf32> to vector<8x32xf32>
    %c0_6 = arith.constant 0 : index
    %c0_7 = arith.constant 0 : index
    %c0_8 = arith.constant 0 : index
    %7 = vector.load %arg5[%c0_6, %c0_7, %c0_8] : memref<1x8x32xf32, #tpu.memory_space<vmem>>, vector<1x8x32xf32>
    %8 = vector.shape_cast %7 : vector<1x8x32xf32> to vector<8x32xf32>
    %cst = arith.constant 0.176776692 : f32
    %9 = vector.broadcast %cst : f32 to vector<8x32xf32>
    %10 = arith.mulf %4, %9 : vector<8x32xf32>
    %cst_9 = arith.constant dense<0.000000e+00> : vector<8x8xf32>
    %11 = tpu.matmul %10, %6, %cst_9 {dimension_numbers = #tpu.dot_dimension_numbers<[1], [1], [0], [0], [0, 0, 1, 0], [], []>} : vector<8x32xf32>, vector<8x32xf32>, vector<8x8xf32> -> vector<8x8xf32>
    %c0_10 = arith.constant 0 : index
    %c0_11 = arith.constant 0 : index
    %12 = vector.load %arg7[%c0_10, %c0_11] : memref<8x1xf32, #tpu.memory_space<vmem>>, vector<8x1xf32>
    %cst_12 = arith.constant dense<0xFF800000> : vector<8xf32>
    %13 = vector.multi_reduction <maximumf>, %11, %cst_12 [1] : vector<8x8xf32> to vector<8xf32>
    %14 = vector.shape_cast %13 : vector<8xf32> to vector<8x1xf32>
    %15 = arith.maximumf %12, %14 : vector<8x1xf32>
    %16 = arith.subf %12, %15 : vector<8x1xf32>
    %17 = math.exp %16 : vector<8x1xf32>
    %18 = vector.broadcast %15 : vector<8x1xf32> to vector<8x8xf32>
    %19 = arith.subf %11, %18 : vector<8x8xf32>
    %20 = math.exp %19 : vector<8x8xf32>
    %c0_13 = arith.constant 0 : index
    %c0_14 = arith.constant 0 : index
    %21 = vector.load %arg8[%c0_13, %c0_14] : memref<8x1xf32, #tpu.memory_space<vmem>>, vector<8x1xf32>
    %22 = arith.mulf %17, %21 : vector<8x1xf32>
    %cst_15 = arith.constant dense<0.000000e+00> : vector<8xf32>
    %23 = vector.multi_reduction <add>, %20, %cst_15 [1] : vector<8x8xf32> to vector<8xf32>
    %24 = vector.shape_cast %23 : vector<8xf32> to vector<8x1xf32>
    %25 = arith.addf %22, %24 : vector<8x1xf32>
    %c0_16 = arith.constant 0 : index
    %c0_17 = arith.constant 0 : index
    %26 = vector.load %arg8[%c0_16, %c0_17] : memref<8x1xf32, #tpu.memory_space<vmem>>, vector<8x1xf32>
    tpu.vector_store %arg8[%c0_16, %c0_17], %25 {strides = array<i32>} : memref<8x1xf32, #tpu.memory_space<vmem>>, vector<8x1xf32>,
    %c0_18 = arith.constant 0 : index
    %c0_19 = arith.constant 0 : index
    %27 = vector.load %arg9[%c0_18, %c0_19] : memref<8x32xf32, #tpu.memory_space<vmem>>, vector<8x32xf32>
    %28 = vector.broadcast %17 : vector<8x1xf32> to vector<8x32xf32>
    %29 = arith.mulf %28, %27 : vector<8x32xf32>
    %cst_20 = arith.constant dense<0.000000e+00> : vector<8x32xf32>
    %30 = tpu.matmul %20, %8, %cst_20 {dimension_numbers = #tpu.dot_dimension_numbers<[1], [0], [0], [1], [0, 0, 1, 1], [], []>} : vector<8x8xf32>, vector<8x32xf32>, vector<8x32xf32> -> vector<8x32xf32>
    %31 = arith.addf %29, %30 : vector<8x32xf32>
    %c0_21 = arith.constant 0 : index
    %c0_22 = arith.constant 0 : index
    %32 = vector.load %arg9[%c0_21, %c0_22] : memref<8x32xf32, #tpu.memory_space<vmem>>, vector<8x32xf32>
    tpu.vector_store %arg9[%c0_21, %c0_22], %31 {strides = array<i32>} : memref<8x32xf32, #tpu.memory_space<vmem>>, vector<8x32xf32>,
    %c0_23 = arith.constant 0 : index
    %c0_24 = arith.constant 0 : index
    %33 = vector.load %arg7[%c0_23, %c0_24] : memref<8x1xf32, #tpu.memory_space<vmem>>, vector<8x1xf32>
    tpu.vector_store %arg7[%c0_23, %c0_24], %15 {strides = array<i32>} : memref<8x1xf32, #tpu.memory_space<vmem>>, vector<8x1xf32>,
    %c0_i32_25 = arith.constant 0 : i32
    %34 = arith.cmpi eq, %arg2, %c0_i32_25 : i32
    %35 = arith.extui %34 : i1 to i32
    %c0_i32_26 = arith.constant 0 : i32
    %36 = arith.cmpi ne, %35, %c0_i32_26 : i32
    scf.if %36 {
      %c0_27 = arith.constant 0 : index
      %c0_28 = arith.constant 0 : index
      %37 = vector.load %arg8[%c0_27, %c0_28] : memref<8x1xf32, #tpu.memory_space<vmem>>, vector<8x1xf32>
      %38 = tpu.reciprocal %37 {approx = true} : vector<8x1xf32> -> vector<8x1xf32>
      %c0_29 = arith.constant 0 : index
      %c0_30 = arith.constant 0 : index
      %39 = vector.load %arg9[%c0_29, %c0_30] : memref<8x32xf32, #tpu.memory_space<vmem>>, vector<8x32xf32>
      %40 = vector.broadcast %38 : vector<8x1xf32> to vector<8x32xf32>
      %41 = arith.mulf %39, %40 : vector<8x32xf32>
      %c0_31 = arith.constant 0 : index
      %c0_32 = arith.constant 0 : index
      %c0_33 = arith.constant 0 : index
      %42 = vector.load %arg6[%c0_31, %c0_32, %c0_33] : memref<1x8x32xf32, #tpu.memory_space<vmem>>, vector<1x8x32xf32>
      %43 = vector.shape_cast %42 : vector<1x8x32xf32> to vector<8x32xf32>
      %44 = vector.shape_cast %41 : vector<8x32xf32> to vector<1x8x32xf32>
      tpu.vector_store %arg6[%c0_31, %c0_32, %c0_33], %44 {strides = array<i32>} : memref<1x8x32xf32, #tpu.memory_space<vmem>>, vector<1x8x32xf32>,
    } else {
    }
    return
  }
  func.func @transform_0(%arg0: i32, %arg1: i32, %arg2: i32) -> (i32, i32, i32) {
    %c0_i32 = arith.constant 0 : i32
    %c0_i32_0 = arith.constant 0 : i32
    return %arg0, %arg1, %c0_i32 : i32, i32, i32
  }
  func.func @transform_1(%arg0: i32, %arg1: i32, %arg2: i32) -> (i32, i32, i32) {
    %c0_i32 = arith.constant 0 : i32
    %c0_i32_0 = arith.constant 0 : i32
    return %arg0, %arg2, %c0_i32 : i32, i32, i32
  }
  func.func @transform_2(%arg0: i32, %arg1: i32, %arg2: i32) -> (i32, i32, i32) {
    %c0_i32 = arith.constant 0 : i32
    %c0_i32_0 = arith.constant 0 : i32
    return %arg0, %arg2, %c0_i32 : i32, i32, i32
  }
  func.func @transform_3(%arg0: i32, %arg1: i32, %arg2: i32) -> (i32, i32, i32) {
    %c0_i32 = arith.constant 0 : i32
    %c0_i32_0 = arith.constant 0 : i32
    return %arg0, %arg1, %c0_i32 : i32, i32, i32
  }
}

</mosaic_0001>

<bundles_post_ra>
// kernel: tpu_custom_call.1
= control target key start
LH: loop header
LB: loop body
LE: loop exit
PB: predicated region body
PF: predicated region fallthrough
CT: control target
= control target key end

     0   :  { %s1026_s0 = inlined_call_operand.hbm [shape: f32[2,8,32], index: 0, kind: input, shape index: {}]   ;;  %s1027_s1 = inlined_call_operand.hbm [shape: f32[2,8,32], index: 1, kind: input, shape index: {}]   ;;  %s1028_s2 = inlined_call_operand.hbm [shape: f32[2,8,32], index: 2, kind: input, shape index: {}]   ;;  %s1029_s3 = inlined_call_operand.hbm [shape: f32[2,8,32], index: 3, kind: output, shape index: {}]  }
   0x1   :  { %1032 = sst [smem:[#allocation18_spill]] %s1027_s1 }
   0x2   :  { %8 = vsyncpa [#allocation6], 0 }
   0x3   :  { %10 = vsyncpa [#allocation6 + $0x1], 0 }
   0x4   :  { %11 = vsyncpa [#allocation9], 0 }
   0x5   :  { %13 = vsyncpa [#allocation9 + $0x1], 0 }
   0x6   :  { %14 = vsyncpa [#allocation7], 0 }
   0x7   :  { %16 = vsyncpa [#allocation7 + $0x1], 0  ;;  %s856_s12 = smov 0   ;;  %s858_s13 = smov 0  }
   0x8   :  { %s860_s14 = smov 0   ;;  %s862_s15 = smov 0  }
   0x9   :  { %s864_s16 = smov 0   ;;  %s866_s17 = smov 0  }
   0xa LB: > { %1033 = sst [smem:[#allocation15_spill]] %s827_s16  ;;  %s887_s18 = sadd.s32 4294967295, %s831_s17   ;;  %s831_s17 = sphi %s866_s17, %s22_s17   ;;  %s827_s16 = sphi %s864_s16, %s1045_s16   ;;  %s823_s15 = sphi %s862_s15, %s1044_s15   ;;  %s819_s14 = sphi %s860_s14, %s1048_s14   ;;  %s815_s13 = sphi %s858_s13, %s1047_s13   ;;  %s811_s12 = sphi %s856_s12, %s1046_s12  }
   0xb   : > { %s550_s19 = sadd.s32 4294967294, %s831_s17   ;;  %s41_s20 = sadd.s32 1, %s827_s16 }
   0xc   : > { %s50_s21 = sadd.s32 1, %s819_s14  ;;  %p43_p0 = scmp.ge.s32.totalorder %s41_s20, 2 }
   0xd   : > { %p57_p1 = scmp.ne.s32.totalorder %s819_s14, %s815_s13  ;;  %p58_p2 = scmp.eq.s32.totalorder %s831_s17, 0 }
   0xe   : > { %p63_p3 = scmp.ne.s32.totalorder %s815_s13, %s811_s12  ;;  %s1050_s20 = smov (%p43_p0, %s41_s20), 0 }
   0xf   : > { %1034 = sst [smem:[#allocation16_spill]] %s1050_s20  ;;  %p899_p4 = por %p58_p2, %p57_p1 }
  0x10   : > { %p64_p5 = scmp.eq.s32.totalorder %s887_s18, 0  ;;  %s45_s23 = ssub.s32 %s827_s16, %s1050_s20 }
  0x11   : > { %p145_p6 = scmp.eq.s32.totalorder %s887_s18, 1  ;;  %p48_p7 = scmp.eq.s32.totalorder %s45_s23, 0 }
  0x12   : > { %p907_p8 = por %p64_p5, %p63_p3  ;;  %p151_p10 = scmp.eq.s32.totalorder %s550_s19, 1 }
  0x13   : > { %p911_p9 = por %p145_p6, %p57_p1  ;;  %p552_p12 = scmp.ge.s32.totalorder %s831_s17, 2 }
  0x14   : > { %s916_s26 = scalar_select %p48_p7, %s819_s14, %s50_s21  }
  0x15   : > { %p918_p11 = por %p151_p10, %p63_p3  ;;  %p593_p13 = scmp.lt.s32.totalorder %s831_s17, 2 }
  0x16   : > { %1038 = sst [smem:[#allocation17_spill]] %s916_s26  ;;  %s171_s28 = sand.u32 1, %s819_s14  }
  0x17   : > { %s553_s29 = sshll.u32 %s171_s28, 3  ;;  %s554_s30 = sshll.u32 %s827_s16, 3 }
  0x18   : > { %p928_p0 = pnand %p593_p13, %p899_p4  ;;  %s191_s5 = sand.u32 1, %s831_s17  }
  0x19   : > { %s1041_s1 = sld [smem:[#allocation18_spill]]  ;;  %s195_s10 = scalar_lea.vmem [#allocation8], %s553_s29 }
  0x1a   : > { %s204_s11 = sshll.u32 %s195_s10, 4  ;;  %s192_s19 = scalar_lea.sflag [#allocation9], %s191_s5  ;;  %s205_s11 = int_to_ptr.vmem [resolvable:$true] %s204_s11 }
  0x1b   : > { %p559_p1 = scmp.ge.s32.totalorder %s831_s17, 1  ;;  %p229_p2 = scmp.lt.s32.totalorder %s831_s17, 3 }
  0x1c   : > { %s180_s6 = scalar_lea.hbm %s1026_s0, %s554_s30  ;;  %s172_s10 = scalar_lea.sflag [#allocation6], %s171_s28 }
  0x1d   : > { %p940_p3 = pnand %p559_p1, %p229_p2  ;;  %s182_s7 = sshll.u32 %s180_s6, 4  ;;  %s183_s7 = int_to_ptr.hbm [resolvable:$true] %s182_s7 }
  0x1e   : > { %s215_s16 = scalar_lea.vmem [#allocation10], %s553_s29  ;;  %s957_s22 = sand.u32 (!%p940_p3), 1, %s815_s13  }
  0x1f   : > { %s200_s8 = scalar_lea.hbm %s1041_s1, %s554_s30  ;;  %s224_s26 = sshll.u32 %s215_s16, 4  ;;  %s225_s26 = int_to_ptr.vmem [resolvable:$true] %s224_s26 }
  0x20   : > { %s202_s9 = sshll.u32 %s200_s8, 4  ;;  %s175_s8 = scalar_lea.vmem [#allocation5], %s553_s29  ;;  %s203_s9 = int_to_ptr.hbm [resolvable:$true] %s202_s9 }
  0x21   : > { %585 = dma.hbm_to_vmem [thread:$0]  (!%p928_p0), %s203_s9, 128, %s205_s11, %s192_s19  }
  0x22   : > { %s184_s1 = sshll.u32 %s175_s8, 4  ;;  %s220_s11 = scalar_lea.hbm %s1028_s2, %s554_s30  ;;  %s185_s1 = int_to_ptr.vmem [resolvable:$true] %s184_s1 }
  0x23   : > { %582 = dma.hbm_to_vmem [thread:$0]  (!%p928_p0), %s183_s7, 128, %s185_s1, %s172_s10  }
  0x24   : > { %s222_s20 = sshll.u32 %s220_s11, 4  ;;  %233 = sbr.rel (%p940_p3) target bundleno = 650 (0x28a), region = 32  ;;  %s223_s20 = int_to_ptr.hbm [resolvable:$true] %s222_s20 }
  0x25   : > { %588 = dma.hbm_to_vmem [thread:$0]  (!%p928_p0), %s223_s20, 128, %s225_s26, %s192_s19  }
  0x26   : > { %s960_s1 = sshll.u32 (!%p940_p3), %s957_s22, 3  ;;  %s236_s28 = scalar_lea.sflag (!%p940_p3), [#allocation6], %s957_s22 }
  0x27   : > { %s239_s30 = scalar_lea.vmem (!%p940_p3), [#allocation5], %s960_s1 }
  0x29   : > { %798 = dma.done.wait (%p907_p8), %s236_s28, 128  }
  0x2a   : > { %800 = vsyncadd (%p907_p8), %s236_s28, 4294967168  ;;  %s245_s16 = sand.u32 1, %s887_s18   ;;  %s249_s26 = scalar_lea.vmem [#allocation8], %s960_s1 }
  0x2b   : > { %s246_s20 = scalar_lea.sflag [#allocation9], %s245_s16 }
  0x2c   : > { %802 = dma.done.wait (%p907_p8), %s246_s20, 256  }
  0x2d   : > { %804 = vsyncadd (%p907_p8), %s246_s20, 4294967040  ;;  %vm300_vm0 = vcmask 261120   ;;  %v833_v0 = vmov 0.0   ;;  %v303_v1 = vld [vmem:[%s249_s26] sm:$0xff]  ;;  %v302_v2 = vld [vmem:[%s239_s30] sm:$0xff]  ;;  %vm297_vm1 = vcmask 7168  }
  0x2e   : > { %301 = vst.msk [vmem:[#allocation4] sm:$0xff] %vm300_vm0, %v833_v0  ;;  %564 = vmatpush.xpose.msk.msra.mxu0 %vm300_vm0, %v303_v1  ;;  %v305_v3 = vmul.f32 0.17677669, %v302_v2  ;;  %v834_v4 = vmov -inf   ;;  %vm334_vm2 = vcmask 64512   ;;  %v835_v7 = vmov 0  }
  0x2f   : > { %298 = vst.msk [vmem:[#allocation2] sm:$0xff] %vm297_vm1, %v834_v4  ;;  %646 = vset.pattern.permute.xlu0 %v835_v7  ;;  %647 = vset.pattern.permute.xlu1 %v835_v7  ;;  %s259_s18 = scalar_lea.vmem [#allocation10], %s960_s1  ;;  %s568_s24 = sshll.u32 %s823_s15, 3 }
  0x30   : > { %299 = vst.msk [vmem:[#allocation3] sm:$0xff] %vm297_vm1, %v833_v0  ;;  %648 = vset.pattern.permute.xlu2 %v835_v7  ;;  %v304_v12 = vld [vmem:[%s259_s18] sm:$0xff]  ;;  %s416_s19 = scalar_lea.hbm %s1029_s3, %s568_s24  ;;  %s292_s21 = scalar_lea.vmem [#allocation11], %s960_s1 }
  0x31   : > { %565 = vmatmul.msk.f32.vlgmr.msra.gmra.mxu0 %vm300_vm0, %v305_v3  ;;  %383 = vmatpush.msra.mxu1 %v304_v12  ;;  %s418_s23 = sshll.u32 %s292_s21, 4  ;;  %s420_s6 = sshll.u32 %s416_s19, 4  ;;  %s419_s23 = int_to_ptr.vmem [resolvable:$true] %s418_s23  ;;  %s421_s6 = int_to_ptr.hbm [resolvable:$true] %s420_s6 }
  0x32   : > { %s405_s7 = scalar_lea.sflag [#allocation7], %s957_s22  ;;  %s759_s8 = sshra.s32 %s421_s6, 4  ;;  %s760_s8 = int_to_ptr.hbm [resolvable:$true] %s759_s8 }
  0x33   : > { %s761_s10 = scalar_lea.hbm %s760_s8, 8  ;;  %s765_s9 = scalar_lea.hbm %s1029_s3, 16 }
  0x34   : > { %p762_p4 = scmp.ne.s32.totalorder %s760_s8, %s761_s10  ;;  %p766_p7 = scmp.lt.s32.totalorder %s760_s8, %s1029_s3 }
  0x35   : > { %v358_v26 = vld [vmem:[#allocation4] sm:$0xff]  ;;  %p767_p8 = scmp.lt.s32.totalorder %s765_s9, %s761_s10 }
  0x36   : > { %v333_v8 = vld [vmem:[#allocation2] sm:$0xff]  ;;  %p763_p5 = pnand %p762_p4, %p911_p9 }
  0x37   : > { %v350_v20 = vld [vmem:[#allocation3] sm:$0xff]  ;;  %p768_p10 = por %p767_p8, %p766_p7 }
  0x38   : > { %p764_p6 = pneg %p763_p5 }
  0x3a   : > { %p769_p13 = pnand %p768_p10, %p764_p6 }
  0xae   : > { %v330_v5 = vpop.f32.mrf.mxu0 }
  0xaf   : > { %v335_v6 = vsel %vm334_vm2, %v330_v5, -inf }
  0xb0   : > { %336 = vmax.xlane.f32.xlu0 %v335_v6 }
 0x123   : > { %v337_v9 = vpop.xlane.xlu0 %336 }
 0x124   : > { %v338_v10 = vmax.f32 %v333_v8, %v337_v9 }
 0x126   : > { %v339_v11 = vsub.f32 %v333_v8, %v338_v10  ;;  %390 = vst.msk [vmem:[#allocation2] sm:$0xff] %vm297_vm1, %v338_v10  ;;  %344 = vperm.xlu0 %646, %v338_v10  }
 0x128   : > { %v340_v18 = vmul.f32 1.442695, %v339_v11 }
 0x198   : > { %v345_v13 = vpop.permute.xlu0 %344 }
 0x199   : > { %v347_v14 = vsub.f32 %v330_v5, %v345_v13 }
 0x19b   : > { %v348_v15 = vmul.f32 1.442695, %v347_v14 }
 0x19d   : > { %649 = vpow2.f32 %v348_v15 }
 0x19e   : > { %651 = vpow2.f32 %v340_v18 }
 0x1a3   : > { %v650_v16 = vpop.eup %649 }
 0x1a4   : > { %566 = vmatmul.msk.f32.vlgmr.msra.gmra.mxu1 %vm334_vm2, %v650_v16  ;;  %v352_v17 = vsel %vm334_vm2, %v650_v16, 0.0  ;;  %v652_v19 = vpop.eup %651 }
 0x1a5   : > { %353 = vadd.xlane.f32.xlu1 %v352_v17  ;;  %v351_v21 = vmul.f32 %v652_v19, %v350_v20 }
 0x1be   : > { %361 = vperm.xlu1 %647, %v652_v19  }
 0x218   : > { %v354_v22 = vpop.xlane.xlu1 %353 }
 0x219   : > { %v355_v23 = vadd.f32 %v354_v22, %v351_v21 }
 0x21b   : > { %357 = vst.msk [vmem:[#allocation3] sm:$0xff] %vm297_vm1, %v355_v23 }
 0x221   : > { %v385_v29 = vpop.f32.mrf.mxu1 }
 0x222   : > { %v394_v24 = vld [vmem:[#allocation3] sm:$0xff] }
 0x223   : > { %653 = vrcp.f32 %v394_v24 }
 0x229   : > { %v654_v25 = vpop.eup %653 }
 0x22a   : > { %399 = vperm.xlu2 %648, %v654_v25  }
 0x230   : > { %v362_v27 = vpop.permute.xlu1 %361 }
 0x231   : > { %v364_v28 = vmul.f32 %v362_v27, %v358_v26 }
 0x233   : > { %v388_v30 = vadd.f32 %v385_v29, %v364_v28 }
 0x235   : > { %389 = vst.msk [vmem:[#allocation4] sm:$0xff] %vm300_vm0, %v388_v30 }
 0x23c   : > { %v396_v31 = vld [vmem:[#allocation4] sm:$0xff] }
 0x284   : > { %v400_v32 = vpop.permute.xlu2 %399 }
 0x285   : > { %v402_v33 = vmul.f32 %v400_v32, %v396_v31 }
 0x287   : > { %403 = vst.msk [vmem:[%s292_s21] sm:$0xff] %vm300_vm0, %v402_v33 }
 0x288   : > { %772 = shalt.err (!%p769_p13)
}
 0x289   : > { %577 = dma.vmem_to_hbm [thread:$0]  (%p911_p9), %s419_s23, 128, %s421_s6, %s405_s7  }
 0x28a PF: > { %s432_s22 = sand.u32 1, %s811_s12   ;;  %p590_p0 = pnand %p552_p12, %p918_p11 }
 0x28b   : > { %s433_s28 = scalar_lea.sflag [#allocation7], %s432_s22 }
 0x28c   : > { %p591_p1 = pneg %p590_p0 }
 0x28e   : > { %806 = dma.done.wait (%p591_p1), %s433_s28, 128  }
 0x28f   : > { %808 = vsyncadd (%p591_p1), %s433_s28, 4294967168  ;;  %s22_s17 = sadd.s32 1, %s831_s17   ;;  %s1043_s30 = sld [smem:[#allocation17_spill]] }
 0x290   : > { %p19_p2 = scmp.ge.s32.totalorder %s22_s17, 4   ;;  %s1044_s15 = sld [smem:[#allocation15_spill]] }
 0x291   : > { %s1045_s16 = sld [smem:[#allocation16_spill]]  ;;  %s1046_s12 = smov %s815_s13 }
 0x292   : > { %s1047_s13 = smov %s819_s14  ;;  %21 = sbr.rel (!%p19_p2) target bundleno = 10 (0xa), region = 109 }
 0x295   : > { %s1048_s14 = smov %s1043_s30 }
 0x297   :  { %439 = vsyncpa [#allocation6], 1 }
 0x298   :  { %441 = vsyncpa [#allocation6 + $0x1], 1 }
 0x299   :  { %442 = vsyncpa [#allocation9], 1 }
 0x29a   :  { %444 = vsyncpa [#allocation9 + $0x1], 1 }
 0x29b   :  { %445 = vsyncpa [#allocation7], 1 }
 0x29c   :  { %447 = vsyncpa [#allocation7 + $0x1], 1 }

</bundles_post_ra>
